<compile_context>
chip_gen: v7x
topology: tpu7x:2x2x1
jax: 0.10.0
libtpu: 0.0.40
codegen_flags: <defaults>
</compile_context>

<pallas_src>
import jax
import jax.numpy as jnp
from jax.experimental import pallas as pl
from jax.experimental.pallas import tpu as pltpu


def _channel_shuffle_kernel(v1_ref, v2_ref, i1_ref, i2_ref,
                            o0_ref, o1_ref, o2_ref, o3_ref):
    hw = v1_ref.shape[-1]          # flattened H*W (lane axis of each input block)
    cpg = v1_ref.shape[-2] // 4    # channels each source contributes per chunk (= 8)
    srcs = (v1_ref, v2_ref, i1_ref, i2_ref)
    outs = (o0_ref, o1_ref, o2_ref, o3_ref)
    for j, o_ref in enumerate(outs):        # output chunk j
        for g, s_ref in enumerate(srcs):    # source stream g
            # out_j channel (4k+g) == srcs[g] channel (8j+k); in the (1, 8, 4*HW)
            # view of out_j that is the contiguous lane slab [g*HW, (g+1)*HW).
            o_ref[:, :, g * hw:(g + 1) * hw] = s_ref[:, j * cpg:(j + 1) * cpg, :]


def mix_method_channel_shuffle(vis1, vis2, ir1, ir2):
    """Pallas TPU implementation of Mix_method.forward (channel_shuffle)."""
    assert vis1.shape == vis2.shape == ir1.shape == ir2.shape
    assert vis1.dtype == vis2.dtype == ir1.dtype == ir2.dtype
    b, c, h, w = vis1.shape
    # forward() splits the 4*C shuffled channels into 4 chunks of 32 -> C == 32.
    assert c == 32, "Mix_method.forward expects 32 channels per input"
    hw = h * w
    cpg = c // 4  # 8

    # Free (layout-preserving) reshapes only -- no jnp.pad, no copies.
    ins = [x.reshape(b, c, hw) for x in (vis1, vis2, ir1, ir2)]

    in_spec = pl.BlockSpec((1, c, hw), lambda i: (i, 0, 0))
    out_spec = pl.BlockSpec((1, cpg, 4 * hw), lambda i: (i, 0, 0))
    out_sds = jax.ShapeDtypeStruct((b, cpg, 4 * hw), vis1.dtype)

    outs = pl.pallas_call(
        _channel_shuffle_kernel,
        out_shape=(out_sds, out_sds, out_sds, out_sds),
        grid_spec=pltpu.PrefetchScalarGridSpec(
            num_scalar_prefetch=0,
            grid=(b,),
            in_specs=[in_spec, in_spec, in_spec, in_spec],
            out_specs=[out_spec, out_spec, out_spec, out_spec],
        ),
        compiler_params=pltpu.CompilerParams(
            dimension_semantics=("parallel",),
            # Blocks are sized by C*H*W; raise the scoped VMEM cap so realistic
            # feature maps still fit (kept <= v7x's 64 MiB physical VMEM).
            vmem_limit_bytes=64 * 1024 * 1024,
        ),
    )(*ins)

    # (B, 8, 4*HW) -> (B, 32, H, W) is a row-major-equivalent (free) reshape.
    return tuple(o.reshape(b, c, h, w) for o in outs)


def _reference_channel_shuffle(vis1, vis2, ir1, ir2):
    out = jnp.concatenate((vis1, vis2, ir1, ir2), axis=1)
    b, c, h, w = out.shape
    group = 4
    out = out.reshape(b, group, c // group, h, w)
    out = jnp.transpose(out, (0, 2, 1, 3, 4)).reshape(b, c, h, w)
    return tuple(out[:, i * 32:(i + 1) * 32] for i in range(4))


if __name__ == "__main__":
    key = jax.random.PRNGKey(0)
    k1, k2, k3, k4 = jax.random.split(key, 4)
    shape = (2, 32, 16, 16)  # N, C, H, W  (C=32 as the module's split(…, 32) implies)
    vis1 = jax.random.normal(k1, shape, dtype=jnp.float32)
    vis2 = jax.random.normal(k2, shape, dtype=jnp.float32)
    ir1 = jax.random.normal(k3, shape, dtype=jnp.float32)
    ir2 = jax.random.normal(k4, shape, dtype=jnp.float32)

    outs = jax.jit(mix_method_channel_shuffle)(vis1, vis2, ir1, ir2)
    outs = jax.block_until_ready(outs)

    refs = _reference_channel_shuffle(vis1, vis2, ir1, ir2)
    assert len(outs) == 4
    for o, r in zip(outs, refs):
        assert o.shape == shape
        assert bool(jnp.array_equal(o, r))  # pure data movement -> exact match
    print("KERNEL_OK")
</pallas_src>

<mosaic_0001>
module attributes {stable_mosaic.version = 11 : i64} {
  func.func @_channel_shuffle_kernel(%arg0: i32, %arg1: memref<1x32x256xf32, #tpu.memory_space<vmem>>, %arg2: memref<1x32x256xf32, #tpu.memory_space<vmem>>, %arg3: memref<1x32x256xf32, #tpu.memory_space<vmem>>, %arg4: memref<1x32x256xf32, #tpu.memory_space<vmem>>, %arg5: memref<1x8x1024xf32, #tpu.memory_space<vmem>>, %arg6: memref<1x8x1024xf32, #tpu.memory_space<vmem>>, %arg7: memref<1x8x1024xf32, #tpu.memory_space<vmem>>, %arg8: memref<1x8x1024xf32, #tpu.memory_space<vmem>>) attributes {dimension_semantics = [#tpu.dimension_semantics<parallel>], iteration_bounds = array<i64: 2>, scalar_prefetch = 0 : i64, scratch_operands = 0 : i64, tpu.core_type = #tpu.core_type<tc>, window_params = [{transform_indices = @transform_0, window_bounds = array<i64: 1, 32, 256>}, {transform_indices = @transform_1, window_bounds = array<i64: 1, 32, 256>}, {transform_indices = @transform_2, window_bounds = array<i64: 1, 32, 256>}, {transform_indices = @transform_3, window_bounds = array<i64: 1, 32, 256>}, {transform_indices = @transform_4, window_bounds = array<i64: 1, 8, 1024>}, {transform_indices = @transform_5, window_bounds = array<i64: 1, 8, 1024>}, {transform_indices = @transform_6, window_bounds = array<i64: 1, 8, 1024>}, {transform_indices = @transform_7, window_bounds = array<i64: 1, 8, 1024>}]} {
    %c0 = arith.constant 0 : index
    %c0_0 = arith.constant 0 : index
    %c0_1 = arith.constant 0 : index
    %0 = vector.load %arg1[%c0, %c0_0, %c0_1] : memref<1x32x256xf32, #tpu.memory_space<vmem>>, vector<1x8x256xf32>
    %c0_2 = arith.constant 0 : index
    %c0_3 = arith.constant 0 : index
    %c0_4 = arith.constant 0 : index
    %1 = vector.load %arg5[%c0_2, %c0_3, %c0_4] : memref<1x8x1024xf32, #tpu.memory_space<vmem>>, vector<1x8x256xf32>
    tpu.vector_store %arg5[%c0_2, %c0_3, %c0_4], %0 {strides = array<i32>} : memref<1x8x1024xf32, #tpu.memory_space<vmem>>, vector<1x8x256xf32>,
    %c0_5 = arith.constant 0 : index
    %c0_6 = arith.constant 0 : index
    %c0_7 = arith.constant 0 : index
    %2 = vector.load %arg2[%c0_5, %c0_6, %c0_7] : memref<1x32x256xf32, #tpu.memory_space<vmem>>, vector<1x8x256xf32>
    %c0_8 = arith.constant 0 : index
    %c0_9 = arith.constant 0 : index
    %c256 = arith.constant 256 : index
    %3 = vector.load %arg5[%c0_8, %c0_9, %c256] : memref<1x8x1024xf32, #tpu.memory_space<vmem>>, vector<1x8x256xf32>
    tpu.vector_store %arg5[%c0_8, %c0_9, %c256], %2 {strides = array<i32>} : memref<1x8x1024xf32, #tpu.memory_space<vmem>>, vector<1x8x256xf32>,
    %c0_10 = arith.constant 0 : index
    %c0_11 = arith.constant 0 : index
    %c0_12 = arith.constant 0 : index
    %4 = vector.load %arg3[%c0_10, %c0_11, %c0_12] : memref<1x32x256xf32, #tpu.memory_space<vmem>>, vector<1x8x256xf32>
    %c0_13 = arith.constant 0 : index
    %c0_14 = arith.constant 0 : index
    %c512 = arith.constant 512 : index
    %5 = vector.load %arg5[%c0_13, %c0_14, %c512] : memref<1x8x1024xf32, #tpu.memory_space<vmem>>, vector<1x8x256xf32>
    tpu.vector_store %arg5[%c0_13, %c0_14, %c512], %4 {strides = array<i32>} : memref<1x8x1024xf32, #tpu.memory_space<vmem>>, vector<1x8x256xf32>,
    %c0_15 = arith.constant 0 : index
    %c0_16 = arith.constant 0 : index
    %c0_17 = arith.constant 0 : index
    %6 = vector.load %arg4[%c0_15, %c0_16, %c0_17] : memref<1x32x256xf32, #tpu.memory_space<vmem>>, vector<1x8x256xf32>
    %c0_18 = arith.constant 0 : index
    %c0_19 = arith.constant 0 : index
    %c768 = arith.constant 768 : index
    %7 = vector.load %arg5[%c0_18, %c0_19, %c768] : memref<1x8x1024xf32, #tpu.memory_space<vmem>>, vector<1x8x256xf32>
    tpu.vector_store %arg5[%c0_18, %c0_19, %c768], %6 {strides = array<i32>} : memref<1x8x1024xf32, #tpu.memory_space<vmem>>, vector<1x8x256xf32>,
    %c0_20 = arith.constant 0 : index
    %c8 = arith.constant 8 : index
    %c0_21 = arith.constant 0 : index
    %8 = vector.load %arg1[%c0_20, %c8, %c0_21] : memref<1x32x256xf32, #tpu.memory_space<vmem>>, vector<1x8x256xf32>
    %c0_22 = arith.constant 0 : index
    %c0_23 = arith.constant 0 : index
    %c0_24 = arith.constant 0 : index
    %9 = vector.load %arg6[%c0_22, %c0_23, %c0_24] : memref<1x8x1024xf32, #tpu.memory_space<vmem>>, vector<1x8x256xf32>
    tpu.vector_store %arg6[%c0_22, %c0_23, %c0_24], %8 {strides = array<i32>} : memref<1x8x1024xf32, #tpu.memory_space<vmem>>, vector<1x8x256xf32>,
    %c0_25 = arith.constant 0 : index
    %c8_26 = arith.constant 8 : index
    %c0_27 = arith.constant 0 : index
    %10 = vector.load %arg2[%c0_25, %c8_26, %c0_27] : memref<1x32x256xf32, #tpu.memory_space<vmem>>, vector<1x8x256xf32>
    %c0_28 = arith.constant 0 : index
    %c0_29 = arith.constant 0 : index
    %c256_30 = arith.constant 256 : index
    %11 = vector.load %arg6[%c0_28, %c0_29, %c256_30] : memref<1x8x1024xf32, #tpu.memory_space<vmem>>, vector<1x8x256xf32>
    tpu.vector_store %arg6[%c0_28, %c0_29, %c256_30], %10 {strides = array<i32>} : memref<1x8x1024xf32, #tpu.memory_space<vmem>>, vector<1x8x256xf32>,
    %c0_31 = arith.constant 0 : index
    %c8_32 = arith.constant 8 : index
    %c0_33 = arith.constant 0 : index
    %12 = vector.load %arg3[%c0_31, %c8_32, %c0_33] : memref<1x32x256xf32, #tpu.memory_space<vmem>>, vector<1x8x256xf32>
    %c0_34 = arith.constant 0 : index
    %c0_35 = arith.constant 0 : index
    %c512_36 = arith.constant 512 : index
    %13 = vector.load %arg6[%c0_34, %c0_35, %c512_36] : memref<1x8x1024xf32, #tpu.memory_space<vmem>>, vector<1x8x256xf32>
    tpu.vector_store %arg6[%c0_34, %c0_35, %c512_36], %12 {strides = array<i32>} : memref<1x8x1024xf32, #tpu.memory_space<vmem>>, vector<1x8x256xf32>,
    %c0_37 = arith.constant 0 : index
    %c8_38 = arith.constant 8 : index
    %c0_39 = arith.constant 0 : index
    %14 = vector.load %arg4[%c0_37, %c8_38, %c0_39] : memref<1x32x256xf32, #tpu.memory_space<vmem>>, vector<1x8x256xf32>
    %c0_40 = arith.constant 0 : index
    %c0_41 = arith.constant 0 : index
    %c768_42 = arith.constant 768 : index
    %15 = vector.load %arg6[%c0_40, %c0_41, %c768_42] : memref<1x8x1024xf32, #tpu.memory_space<vmem>>, vector<1x8x256xf32>
    tpu.vector_store %arg6[%c0_40, %c0_41, %c768_42], %14 {strides = array<i32>} : memref<1x8x1024xf32, #tpu.memory_space<vmem>>, vector<1x8x256xf32>,
    %c0_43 = arith.constant 0 : index
    %c16 = arith.constant 16 : index
    %c0_44 = arith.constant 0 : index
    %16 = vector.load %arg1[%c0_43, %c16, %c0_44] : memref<1x32x256xf32, #tpu.memory_space<vmem>>, vector<1x8x256xf32>
    %c0_45 = arith.constant 0 : index
    %c0_46 = arith.constant 0 : index
    %c0_47 = arith.constant 0 : index
    %17 = vector.load %arg7[%c0_45, %c0_46, %c0_47] : memref<1x8x1024xf32, #tpu.memory_space<vmem>>, vector<1x8x256xf32>
    tpu.vector_store %arg7[%c0_45, %c0_46, %c0_47], %16 {strides = array<i32>} : memref<1x8x1024xf32, #tpu.memory_space<vmem>>, vector<1x8x256xf32>,
    %c0_48 = arith.constant 0 : index
    %c16_49 = arith.constant 16 : index
    %c0_50 = arith.constant 0 : index
    %18 = vector.load %arg2[%c0_48, %c16_49, %c0_50] : memref<1x32x256xf32, #tpu.memory_space<vmem>>, vector<1x8x256xf32>
    %c0_51 = arith.constant 0 : index
    %c0_52 = arith.constant 0 : index
    %c256_53 = arith.constant 256 : index
    %19 = vector.load %arg7[%c0_51, %c0_52, %c256_53] : memref<1x8x1024xf32, #tpu.memory_space<vmem>>, vector<1x8x256xf32>
    tpu.vector_store %arg7[%c0_51, %c0_52, %c256_53], %18 {strides = array<i32>} : memref<1x8x1024xf32, #tpu.memory_space<vmem>>, vector<1x8x256xf32>,
    %c0_54 = arith.constant 0 : index
    %c16_55 = arith.constant 16 : index
    %c0_56 = arith.constant 0 : index
    %20 = vector.load %arg3[%c0_54, %c16_55, %c0_56] : memref<1x32x256xf32, #tpu.memory_space<vmem>>, vector<1x8x256xf32>
    %c0_57 = arith.constant 0 : index
    %c0_58 = arith.constant 0 : index
    %c512_59 = arith.constant 512 : index
    %21 = vector.load %arg7[%c0_57, %c0_58, %c512_59] : memref<1x8x1024xf32, #tpu.memory_space<vmem>>, vector<1x8x256xf32>
    tpu.vector_store %arg7[%c0_57, %c0_58, %c512_59], %20 {strides = array<i32>} : memref<1x8x1024xf32, #tpu.memory_space<vmem>>, vector<1x8x256xf32>,
    %c0_60 = arith.constant 0 : index
    %c16_61 = arith.constant 16 : index
    %c0_62 = arith.constant 0 : index
    %22 = vector.load %arg4[%c0_60, %c16_61, %c0_62] : memref<1x32x256xf32, #tpu.memory_space<vmem>>, vector<1x8x256xf32>
    %c0_63 = arith.constant 0 : index
    %c0_64 = arith.constant 0 : index
    %c768_65 = arith.constant 768 : index
    %23 = vector.load %arg7[%c0_63, %c0_64, %c768_65] : memref<1x8x1024xf32, #tpu.memory_space<vmem>>, vector<1x8x256xf32>
    tpu.vector_store %arg7[%c0_63, %c0_64, %c768_65], %22 {strides = array<i32>} : memref<1x8x1024xf32, #tpu.memory_space<vmem>>, vector<1x8x256xf32>,
    %c0_66 = arith.constant 0 : index
    %c24 = arith.constant 24 : index
    %c0_67 = arith.constant 0 : index
    %24 = vector.load %arg1[%c0_66, %c24, %c0_67] : memref<1x32x256xf32, #tpu.memory_space<vmem>>, vector<1x8x256xf32>
    %c0_68 = arith.constant 0 : index
    %c0_69 = arith.constant 0 : index
    %c0_70 = arith.constant 0 : index
    %25 = vector.load %arg8[%c0_68, %c0_69, %c0_70] : memref<1x8x1024xf32, #tpu.memory_space<vmem>>, vector<1x8x256xf32>
    tpu.vector_store %arg8[%c0_68, %c0_69, %c0_70], %24 {strides = array<i32>} : memref<1x8x1024xf32, #tpu.memory_space<vmem>>, vector<1x8x256xf32>,
    %c0_71 = arith.constant 0 : index
    %c24_72 = arith.constant 24 : index
    %c0_73 = arith.constant 0 : index
    %26 = vector.load %arg2[%c0_71, %c24_72, %c0_73] : memref<1x32x256xf32, #tpu.memory_space<vmem>>, vector<1x8x256xf32>
    %c0_74 = arith.constant 0 : index
    %c0_75 = arith.constant 0 : index
    %c256_76 = arith.constant 256 : index
    %27 = vector.load %arg8[%c0_74, %c0_75, %c256_76] : memref<1x8x1024xf32, #tpu.memory_space<vmem>>, vector<1x8x256xf32>
    tpu.vector_store %arg8[%c0_74, %c0_75, %c256_76], %26 {strides = array<i32>} : memref<1x8x1024xf32, #tpu.memory_space<vmem>>, vector<1x8x256xf32>,
    %c0_77 = arith.constant 0 : index
    %c24_78 = arith.constant 24 : index
    %c0_79 = arith.constant 0 : index
    %28 = vector.load %arg3[%c0_77, %c24_78, %c0_79] : memref<1x32x256xf32, #tpu.memory_space<vmem>>, vector<1x8x256xf32>
    %c0_80 = arith.constant 0 : index
    %c0_81 = arith.constant 0 : index
    %c512_82 = arith.constant 512 : index
    %29 = vector.load %arg8[%c0_80, %c0_81, %c512_82] : memref<1x8x1024xf32, #tpu.memory_space<vmem>>, vector<1x8x256xf32>
    tpu.vector_store %arg8[%c0_80, %c0_81, %c512_82], %28 {strides = array<i32>} : memref<1x8x1024xf32, #tpu.memory_space<vmem>>, vector<1x8x256xf32>,
    %c0_83 = arith.constant 0 : index
    %c24_84 = arith.constant 24 : index
    %c0_85 = arith.constant 0 : index
    %30 = vector.load %arg4[%c0_83, %c24_84, %c0_85] : memref<1x32x256xf32, #tpu.memory_space<vmem>>, vector<1x8x256xf32>
    %c0_86 = arith.constant 0 : index
    %c0_87 = arith.constant 0 : index
    %c768_88 = arith.constant 768 : index
    %31 = vector.load %arg8[%c0_86, %c0_87, %c768_88] : memref<1x8x1024xf32, #tpu.memory_space<vmem>>, vector<1x8x256xf32>
    tpu.vector_store %arg8[%c0_86, %c0_87, %c768_88], %30 {strides = array<i32>} : memref<1x8x1024xf32, #tpu.memory_space<vmem>>, vector<1x8x256xf32>,
    return
  }
  func.func @transform_0(%arg0: i32) -> (i32, i32, i32) {
    %c0_i32 = arith.constant 0 : i32
    %c0_i32_0 = arith.constant 0 : i32
    %c0_i32_1 = arith.constant 0 : i32
    return %arg0, %c0_i32, %c0_i32_0 : i32, i32, i32
  }
  func.func @transform_1(%arg0: i32) -> (i32, i32, i32) {
    %c0_i32 = arith.constant 0 : i32
    %c0_i32_0 = arith.constant 0 : i32
    %c0_i32_1 = arith.constant 0 : i32
    return %arg0, %c0_i32, %c0_i32_0 : i32, i32, i32
  }
  func.func @transform_2(%arg0: i32) -> (i32, i32, i32) {
    %c0_i32 = arith.constant 0 : i32
    %c0_i32_0 = arith.constant 0 : i32
    %c0_i32_1 = arith.constant 0 : i32
    return %arg0, %c0_i32, %c0_i32_0 : i32, i32, i32
  }
  func.func @transform_3(%arg0: i32) -> (i32, i32, i32) {
    %c0_i32 = arith.constant 0 : i32
    %c0_i32_0 = arith.constant 0 : i32
    %c0_i32_1 = arith.constant 0 : i32
    return %arg0, %c0_i32, %c0_i32_0 : i32, i32, i32
  }
  func.func @transform_4(%arg0: i32) -> (i32, i32, i32) {
    %c0_i32 = arith.constant 0 : i32
    %c0_i32_0 = arith.constant 0 : i32
    %c0_i32_1 = arith.constant 0 : i32
    return %arg0, %c0_i32, %c0_i32_0 : i32, i32, i32
  }
  func.func @transform_5(%arg0: i32) -> (i32, i32, i32) {
    %c0_i32 = arith.constant 0 : i32
    %c0_i32_0 = arith.constant 0 : i32
    %c0_i32_1 = arith.constant 0 : i32
    return %arg0, %c0_i32, %c0_i32_0 : i32, i32, i32
  }
  func.func @transform_6(%arg0: i32) -> (i32, i32, i32) {
    %c0_i32 = arith.constant 0 : i32
    %c0_i32_0 = arith.constant 0 : i32
    %c0_i32_1 = arith.constant 0 : i32
    return %arg0, %c0_i32, %c0_i32_0 : i32, i32, i32
  }
  func.func @transform_7(%arg0: i32) -> (i32, i32, i32) {
    %c0_i32 = arith.constant 0 : i32
    %c0_i32_0 = arith.constant 0 : i32
    %c0_i32_1 = arith.constant 0 : i32
    return %arg0, %c0_i32, %c0_i32_0 : i32, i32, i32
  }
}

</mosaic_0001>

<bundles_post_ra>
// kernel: mix_method_channel_shuffle.1
= control target key start
LH: loop header
LB: loop body
LE: loop exit
PB: predicated region body
PF: predicated region fallthrough
CT: control target
= control target key end

     0   :  { %s1752_s0 = inlined_call_operand.hbm [shape: f32[2,32,256], index: 0, kind: input, shape index: {}]   ;;  %s1753_s1 = inlined_call_operand.hbm [shape: f32[2,32,256], index: 1, kind: input, shape index: {}]   ;;  %s1754_s2 = inlined_call_operand.hbm [shape: f32[2,32,256], index: 2, kind: input, shape index: {}]   ;;  %s1755_s3 = inlined_call_operand.hbm [shape: f32[2,32,256], index: 3, kind: input, shape index: {}]   ;;  %s1756_s4 = inlined_call_operand.hbm [shape: f32[2,8,1024], index: 4, kind: output, shape index: {0}]   ;;  %s1757_s5 = inlined_call_operand.hbm [shape: f32[2,8,1024], index: 5, kind: output, shape index: {1}]   ;;  %s1758_s6 = inlined_call_operand.hbm [shape: f32[2,8,1024], index: 6, kind: output, shape index: {2}]   ;;  %s1759_s7 = inlined_call_operand.hbm [shape: f32[2,8,1024], index: 7, kind: output, shape index: {3}]  }
   0x1   :  { %1772 = sst [smem:[#allocation26_spill]] %s1752_s0 }
   0x2   :  { %1773 = sst [smem:[#allocation27_spill]] %s1753_s1 }
   0x3   :  { %1774 = sst [smem:[#allocation28_spill]] %s1754_s2 }
   0x4   :  { %13 = vsyncpa [#allocation3], 0 }
   0x5   :  { %15 = vsyncpa [#allocation3 + $0x1], 0 }
   0x6   :  { %16 = vsyncpa [#allocation6], 0 }
   0x7   :  { %18 = vsyncpa [#allocation6 + $0x1], 0 }
   0x8   :  { %19 = vsyncpa [#allocation9], 0 }
   0x9   :  { %21 = vsyncpa [#allocation9 + $0x1], 0 }
   0xa   :  { %22 = vsyncpa [#allocation4], 0 }
   0xb   :  { %24 = vsyncpa [#allocation4 + $0x1], 0 }
   0xc   :  { %25 = vsyncpa [#allocation12], 0 }
   0xd   :  { %27 = vsyncpa [#allocation12 + $0x1], 0 }
   0xe   :  { %28 = vsyncpa [#allocation15], 0 }
   0xf   :  { %30 = vsyncpa [#allocation15 + $0x1], 0  ;;  %s1269_s24 = smov 0   ;;  %s1271_s25 = smov 0  }
  0x10   :  { %s1273_s26 = smov 0   ;;  %s1275_s27 = smov 0  }
  0x11 LB: > { %1775 = sst [smem:[#allocation22_spill]] %s1213_s26  ;;  %s1290_s28 = sadd.s32 4294967295, %s1217_s27   ;;  %s1217_s27 = sphi %s1275_s27, %s1800_s27   ;;  %s1213_s26 = sphi %s1273_s26, %s1802_s26   ;;  %s1209_s25 = sphi %s1271_s25, %s1804_s25   ;;  %s1205_s24 = sphi %s1269_s24, %s1803_s24  }
  0x12   : > { %1776 = sst [smem:[#allocation23_spill]] %s1217_s27  ;;  %s1760_s29 = sadd.s32 4294967294, %s1217_s27  }
  0x13   : > { %s1294_s30 = sadd.s32 1, %s1217_s27   ;;  %s43_s8 = sadd.s32 1, %s1213_s26 }
  0x14   : > { %1777 = sst [smem:[#allocation24_spill]] %s1294_s30  ;;  %s40_s9 = ssub.s32 %s1217_s27, %s1294_s30 }
  0x15   : > { %p50_p0 = scmp.ne.s32.totalorder %s1213_s26, %s1209_s25  ;;  %p41_p1 = scmp.eq.s32.totalorder %s40_s9, 0 }
  0x16   : > { %p51_p2 = scmp.eq.s32.totalorder %s1217_s27, 0  ;;  %p56_p3 = scmp.ne.s32.totalorder %s1209_s25, %s1205_s24 }
  0x17   : > { %p57_p4 = scmp.eq.s32.totalorder %s1290_s28, 0  ;;  %p158_p7 = scmp.eq.s32.totalorder %s1290_s28, 1 }
  0x18   : > { %s1306_s10 = scalar_select %p41_p1, %s1213_s26, %s43_s8  }
  0x19   : > { %p52_p5 = por %p51_p2, %p50_p0  ;;  %p1308_p6 = por %p57_p4, %p56_p3 }
  0x1a   : > { %1778 = sst [smem:[#allocation25_spill]] %s1306_s10  ;;  %p164_p8 = scmp.eq.s32.totalorder %s1760_s29, 1 }
  0x1b   : > { %s1779_s11 = scalar_select %p1308_p6, 1, 0 }
  0x1c   : > { %p895_p10 = scmp.lt.s32.totalorder %s1217_s27, 2  ;;  %p1317_p11 = por %p158_p7, %p50_p0 }
  0x1d   : > { %p1321_p12 = por %p164_p8, %p56_p3  ;;  %s1326_s14 = sand.u32 1, %s1213_s26  }
  0x1e   : > { %s1780_s12 = scalar_select %p1317_p11, 1, 0 }
  0x1f   : > { %s1781_s13 = scalar_select %p1321_p12, 1, 0 }
  0x20   : > { %s1329_s15 = sshll.u32 %s1217_s27, 10  ;;  %s1332_s16 = sshll.u32 %s1326_s14, 6 }
  0x21   : > { %p1334_p13 = pnand %p895_p10, %p52_p5  ;;  %s283_s18 = sand.u32 1, %s1217_s27  }
  0x22   : > { %s1783_s1 = sld [smem:[#allocation27_spill]]  ;;  %s287_s22 = scalar_lea.vmem [#allocation5], %s1332_s16 }
  0x23   : > { %s294_s23 = sshll.u32 %s287_s22, 4  ;;  %s1349_s8 = scalar_lea.sflag [#allocation6], %s283_s18  ;;  %s1346_s23 = int_to_ptr.vmem [resolvable:$true] %s294_s23 }
  0x24   : > { %p1355_p2 = pneg %p1334_p13 }
  0x28   : > { %s1343_s21 = scalar_lea.hbm %s1783_s1, %s1329_s15  ;;  %s936_s22 = scalar_lea.hbm %s1783_s1, 2048 }
  0x29   : > { %s931_s9 = scalar_lea.hbm %s1343_s21, 1024  ;;  %p937_p5 = scmp.lt.u32.totalorder %s1343_s21, %s1783_s1 }
  0x2a   : > { %p932_p1 = scmp.ne.s32.totalorder %s1343_s21, %s931_s9  ;;  %p938_p7 = scmp.lt.u32.totalorder %s936_s22, %s931_s9 }
  0x2b   : > { %p940_p10 = scmp.lt.u32.totalorder %s931_s9, %s1343_s21 }
  0x2c   : > { %p934_p3 = pnand %p1355_p2, %p932_p1  ;;  %p939_p8 = por %p938_p7, %p937_p5 }
  0x2e   : > { %p935_p4 = pneg %p934_p3  ;;  %p941_p9 = por %p940_p10, %p939_p8 }
  0x30   : > { %p942_p0 = pnand %p941_p9, %p935_p4 }
  0x32   : > { %945 = shalt.err (!%p942_p0)
}
  0x33   : > { %s946_s18 = scalar_lea.vmem %s1346_s23, 1024  ;;  %s1219_s19 = smov [#allocation5]  }
  0x34   : > { %p947_p1 = scmp.ne.s32.totalorder %s1346_s23, %s946_s18  ;;  %s951_s20 = sshll.u32 %s1219_s19, 4  ;;  %s952_s20 = int_to_ptr.vmem [resolvable:$false] %s951_s20 }
  0x35   : > { %s953_s26 = scalar_lea.vmem %s952_s20, 2048  ;;  %p954_p11 = scmp.lt.s32.totalorder %s1346_s23, %s952_s20 }
  0x36   : > { %p949_p3 = pnand %p947_p1, %p1355_p2  ;;  %p955_p6 = scmp.lt.s32.totalorder %s953_s26, %s946_s18 }
  0x38   : > { %p950_p12 = pneg %p949_p3  ;;  %p956_p5 = por %p955_p6, %p954_p11 }
  0x3a   : > { %p957_p7 = pnand %p956_p5, %p950_p12 }
  0x3c   : > { %960 = shalt.err (!%p957_p7)
}
  0x3d   : > { %s1764_s10 = smov 256   ;;  %s1766_s9 = smov 16  }
  0x3e   : > { %875 = dma.hbm_to_vmem [thread:$0]  (!%p1334_p13), %s1343_s21, 1024, %s1346_s23, %s1349_s8, %s1764_s10, %s1764_s10, %s1766_s9  }
  0x3f   : > { %p344_p6 = scmp.lt.s32.totalorder %s1217_s27, 3  ;;  %s1785_s0 = sld [smem:[#allocation26_spill]] }
  0x40   : > { %p1786_p9 = scmp.ge.s32.totalorder %s1217_s27, 1  ;;  %s266_s26 = scalar_lea.vmem [#allocation2], %s1332_s16 }
  0x41   : > { %s273_s1 = sshll.u32 %s266_s26, 4  ;;  %s263_s21 = scalar_lea.sflag [#allocation3], %s1326_s14  ;;  %s1396_s1 = int_to_ptr.vmem [resolvable:$true] %s273_s1 }
  0x42   : > { %p1391_p11 = pnand %p1786_p9, %p344_p6 }
  0x44   : > { %s1787_s20 = scalar_select %p1391_p11, 1, 0 }
  0x45   : > { %s1387_s19 = scalar_lea.hbm %s1785_s0, %s1329_s15  ;;  %s966_s10 = scalar_lea.hbm %s1785_s0, 2048 }
  0x46   : > { %s961_s23 = scalar_lea.hbm %s1387_s19, 1024  ;;  %p967_p8 = scmp.lt.u32.totalorder %s1387_s19, %s1785_s0 }
  0x47   : > { %p962_p12 = scmp.ne.s32.totalorder %s1387_s19, %s961_s23  ;;  %p968_p10 = scmp.lt.u32.totalorder %s966_s10, %s961_s23 }
  0x48   : > { %p970_p3 = scmp.lt.u32.totalorder %s961_s23, %s1387_s19 }
  0x49   : > { %p964_p0 = pnand %p962_p12, %p1355_p2  ;;  %p969_p1 = por %p968_p10, %p967_p8 }
  0x4b   : > { %p965_p4 = pneg %p964_p0  ;;  %p971_p5 = por %p970_p3, %p969_p1 }
  0x4d   : > { %p972_p7 = pnand %p971_p5, %p965_p4 }
  0x4f   : > { %975 = shalt.err (!%p972_p7)
}
  0x50   : > { %s976_s26 = scalar_lea.vmem %s1396_s1, 1024  ;;  %s1222_s22 = smov [#allocation2]  }
  0x51   : > { %p977_p6 = scmp.ne.s32.totalorder %s1396_s1, %s976_s26  ;;  %s981_s18 = sshll.u32 %s1222_s22, 4  ;;  %s982_s18 = int_to_ptr.vmem [resolvable:$false] %s981_s18 }
  0x52   : > { %s983_s30 = scalar_lea.vmem %s982_s18, 2048  ;;  %p984_p0 = scmp.lt.s32.totalorder %s1396_s1, %s982_s18 }
  0x53   : > { %p979_p9 = pnand %p977_p6, %p1355_p2  ;;  %p985_p11 = scmp.lt.s32.totalorder %s983_s30, %s976_s26 }
  0x55   : > { %p980_p12 = pneg %p979_p9  ;;  %p986_p8 = por %p985_p11, %p984_p0 }
  0x57   : > { %p987_p10 = pnand %p986_p8, %p980_p12 }
  0x59   : > { %990 = shalt.err (!%p987_p10)
}
  0x5a   : > { %s1788_s10 = smov 16   ;;  %s1789_s9 = smov 256  }
  0x5b   : > { %872 = dma.hbm_to_vmem [thread:$0]  (!%p1334_p13), %s1387_s19, 1024, %s1396_s1, %s263_s21, %s1789_s9, %s1789_s9, %s1788_s10  }
  0x5c   : > { %s1790_s2 = sld [smem:[#allocation28_spill]]  ;;  %s308_s18 = scalar_lea.vmem [#allocation7], %s1332_s16 }
  0x5d   : > { %s315_s30 = sshll.u32 %s308_s18, 4  ;;  %s1432_s30 = int_to_ptr.vmem [resolvable:$true] %s315_s30 }
  0x62   : > { %s1429_s26 = scalar_lea.hbm %s1790_s2, %s1329_s15  ;;  %s996_s19 = scalar_lea.hbm %s1790_s2, 2048 }
  0x63   : > { %s991_s0 = scalar_lea.hbm %s1429_s26, 1024  ;;  %p997_p3 = scmp.lt.u32.totalorder %s1429_s26, %s1790_s2 }
  0x64   : > { %p992_p11 = scmp.ne.s32.totalorder %s1429_s26, %s991_s0  ;;  %p998_p5 = scmp.lt.u32.totalorder %s996_s19, %s991_s0 }
  0x65   : > { %p1000_p6 = scmp.lt.u32.totalorder %s991_s0, %s1429_s26 }
  0x66   : > { %p994_p4 = pnand %p992_p11, %p1355_p2  ;;  %p999_p7 = por %p998_p5, %p997_p3 }
  0x68   : > { %p995_p1 = pneg %p994_p4  ;;  %p1001_p9 = por %p1000_p6, %p999_p7 }
  0x6a   : > { %p1002_p12 = pnand %p1001_p9, %p995_p1 }
  0x6c   : > { %1005 = shalt.err (!%p1002_p12)
}
  0x6d   : > { %s1006_s22 = scalar_lea.vmem %s1432_s30, 1024  ;;  %s1223_s27 = smov [#allocation7]  }
  0x6e   : > { %p1007_p0 = scmp.ne.s32.totalorder %s1432_s30, %s1006_s22  ;;  %s1011_s18 = sshll.u32 %s1223_s27, 4  ;;  %s1012_s18 = int_to_ptr.vmem [resolvable:$false] %s1011_s18 }
  0x6f   : > { %s1013_s1 = scalar_lea.vmem %s1012_s18, 2048  ;;  %p1014_p11 = scmp.lt.s32.totalorder %s1432_s30, %s1012_s18 }
  0x70   : > { %p1009_p8 = pnand %p1007_p0, %p1355_p2  ;;  %p1015_p4 = scmp.lt.s32.totalorder %s1013_s1, %s1006_s22 }
  0x72   : > { %p1010_p10 = pneg %p1009_p8  ;;  %p1016_p3 = por %p1015_p4, %p1014_p11 }
  0x74   : > { %p1017_p5 = pnand %p1016_p3, %p1010_p10 }
  0x76   : > { %1020 = shalt.err (!%p1017_p5)
}
  0x77   : > { %878 = dma.hbm_to_vmem [thread:$0]  (!%p1334_p13), %s1429_s26, 1024, %s1432_s30, %s1349_s8, %s1789_s9, %s1789_s9, %s1788_s10  }
  0x78   : > { %s1463_s21 = scalar_lea.hbm %s1755_s3, %s1329_s15  ;;  %s329_s23 = scalar_lea.vmem [#allocation8], %s1332_s16 }
  0x79   : > { %s336_s22 = sshll.u32 %s329_s23, 4  ;;  %s326_s27 = scalar_lea.sflag [#allocation9], %s1326_s14  ;;  %s1466_s22 = int_to_ptr.vmem [resolvable:$true] %s336_s22 }
  0x7a   : > { %s1021_s18 = scalar_lea.hbm %s1463_s21, 1024  ;;  %s1026_s30 = scalar_lea.hbm %s1755_s3, 2048 }
  0x7b   : > { %p1022_p1 = scmp.ne.s32.totalorder %s1463_s21, %s1021_s18  ;;  %p1027_p9 = scmp.lt.u32.totalorder %s1463_s21, %s1755_s3 }
  0x7c   : > { %p1028_p12 = scmp.lt.u32.totalorder %s1026_s30, %s1021_s18  ;;  %p1030_p8 = scmp.lt.u32.totalorder %s1021_s18, %s1463_s21 }
  0x7d   : > { %p1024_p7 = pnand %p1022_p1, %p1355_p2 }
  0x7e   : > { %p1029_p0 = por %p1028_p12, %p1027_p9 }
  0x7f   : > { %p1025_p6 = pneg %p1024_p7 }
  0x80   : > { %p1031_p10 = por %p1030_p8, %p1029_p0 }
  0x82   : > { %p1032_p11 = pnand %p1031_p10, %p1025_p6 }
  0x84   : > { %1035 = shalt.err (!%p1032_p11)
}
  0x85   : > { %s1036_s16 = scalar_lea.vmem %s1466_s22, 1024  ;;  %s1224_s0 = smov [#allocation8]  }
  0x86   : > { %p1037_p4 = scmp.ne.s32.totalorder %s1466_s22, %s1036_s16  ;;  %s1041_s19 = sshll.u32 %s1224_s0, 4  ;;  %s1042_s19 = int_to_ptr.vmem [resolvable:$false] %s1041_s19 }
  0x87   : > { %s1043_s23 = scalar_lea.vmem %s1042_s19, 2048  ;;  %p1044_p1 = scmp.lt.s32.totalorder %s1466_s22, %s1042_s19 }
  0x88   : > { %p1039_p3 = pnand %p1037_p4, %p1355_p2  ;;  %p1045_p7 = scmp.lt.s32.totalorder %s1043_s23, %s1036_s16 }
  0x8a   : > { %p1040_p5 = pneg %p1039_p3  ;;  %p1046_p9 = por %p1045_p7, %p1044_p1 }
  0x8c   : > { %p1047_p12 = pnand %p1046_p9, %p1040_p5 }
  0x8e   : > { %1050 = shalt.err (!%p1047_p12)
}
  0x8f   : > { %881 = dma.hbm_to_vmem [thread:$0]  (!%p1334_p13), %s1463_s21, 1024, %s1466_s22, %s326_s27, %s1789_s9, %s1789_s9, %s1788_s10  }
  0x90   : > { %p1791_p2 = scmp.ne.s32.totalorder %s1787_s20, 0 }
  0x91   : > { %s1498_s29 = sand.u32 (!%p1791_p2), 1, %s1209_s25   ;;  %p1792_p6 = scmp.ne.s32.totalorder (!%p1791_p2), %s1779_s11, 0 }
  0x92   : > { %348 = sbr.rel (%p1791_p2) target bundleno = 258 (0x102), region = 36  ;;  %s1501_s18 = sshll.u32 (!%p1791_p2), %s1498_s29, 6 }
  0x93   : > { %s351_s17 = scalar_lea.sflag (!%p1791_p2), [#allocation3], %s1498_s29  ;;  %s1505_s8 = scalar_lea.vmem (!%p1791_p2), [#allocation2], %s1501_s18 }
  0x99   : > { %1180 = dma.done.wait (%p1792_p6), %s351_s17, 1024  }
  0x9a   : > { %1182 = vsyncadd (%p1792_p6), %s351_s17, 4294966272  ;;  %s359_s14 = sand.u32 1, %s1290_s28   ;;  %s1515_s10 = scalar_lea.vmem [#allocation5], %s1501_s18 }
  0x9b   : > { %s360_s20 = scalar_lea.sflag [#allocation6], %s359_s14 }
  0x9c   : > { %1184 = dma.done.wait (%p1792_p6), %s360_s20, 2048  }
  0x9d   : > { %1186 = vsyncadd (%p1792_p6), %s360_s20, 4294965248  ;;  %s1522_s9 = scalar_lea.vmem [#allocation7], %s1501_s18  ;;  %s378_s21 = scalar_lea.sflag [#allocation9], %s1498_s29 }
  0x9e   : > { %s1526_s22 = scalar_lea.vmem [#allocation8], %s1501_s18 }
  0x9f   : > { %1188 = dma.done.wait (%p1792_p6), %s378_s21, 1024  }
  0xa0   : > { %1190 = vsyncadd (%p1792_p6), %s378_s21, 4294966272  ;;  %s1533_s27 = sshll.u32 %s1290_s28, 10  ;;  %s427_s26 = scalar_lea.vmem [#allocation11], %s1501_s18  ;;  %v458_v0 = vld [vmem:[%s1505_s8 + $0x10] sm:$0xff]  ;;  %v459_v1 = vld [vmem:[%s1505_s8 + $0x18] sm:$0xff] }
  0xa1   : > { %s550_s30 = sshll.u32 %s427_s26, 4  ;;  %v462_v2 = vld [vmem:[%s1515_s10 + $0x10] sm:$0xff]  ;;  %s1540_s11 = scalar_lea.vmem [#allocation10], %s1501_s18  ;;  %460 = vst [vmem:[%s427_s26] sm:$0xff] %v458_v0  ;;  %461 = vst [vmem:[%s427_s26 + $0x8] sm:$0xff] %v459_v1  ;;  %v463_v3 = vld [vmem:[%s1515_s10 + $0x18] sm:$0xff]  ;;  %s1552_s30 = int_to_ptr.vmem [resolvable:$true] %s550_s30 }
  0xa2   : > { %s536_s15 = sshll.u32 %s1540_s11, 4  ;;  %464 = vst [vmem:[%s427_s26 + $0x10] sm:$0xff] %v462_v2  ;;  %v466_v4 = vld [vmem:[%s1522_s9 + $0x10] sm:$0xff]  ;;  %v467_v5 = vld [vmem:[%s1522_s9 + $0x18] sm:$0xff]  ;;  %s1550_s0 = scalar_lea.hbm %s1757_s5, %s1533_s27  ;;  %465 = vst [vmem:[%s427_s26 + $0x18] sm:$0xff] %v463_v3  ;;  %s1571_s15 = int_to_ptr.vmem [resolvable:$true] %s536_s15 }
  0xa3   : > { %468 = vst [vmem:[%s427_s26 + $0x20] sm:$0xff] %v466_v4  ;;  %469 = vst [vmem:[%s427_s26 + $0x28] sm:$0xff] %v467_v5  ;;  %v470_v6 = vld [vmem:[%s1526_s22 + $0x10] sm:$0xff]  ;;  %v471_v7 = vld [vmem:[%s1526_s22 + $0x18] sm:$0xff]  ;;  %s1558_s19 = scalar_lea.vmem [#allocation13], %s1501_s18  ;;  %s1569_s21 = scalar_lea.hbm %s1756_s4, %s1533_s27 }
  0xa4   : > { %v442_v8 = vld [vmem:[%s1505_s8] sm:$0xff]  ;;  %472 = vst [vmem:[%s427_s26 + $0x30] sm:$0xff] %v470_v6  ;;  %473 = vst [vmem:[%s427_s26 + $0x38] sm:$0xff] %v471_v7  ;;  %v443_v9 = vld [vmem:[%s1505_s8 + $0x8] sm:$0xff]  ;;  %s1581_s26 = scalar_lea.sflag [#allocation12], %s359_s14  ;;  %s1051_s1 = scalar_lea.vmem %s1552_s30, 1024 }
  0xa5   : > { %444 = vst [vmem:[%s1540_s11] sm:$0xff] %v442_v8  ;;  %v446_v10 = vld [vmem:[%s1515_s10] sm:$0xff]  ;;  %v447_v11 = vld [vmem:[%s1515_s10 + $0x8] sm:$0xff]  ;;  %445 = vst [vmem:[%s1540_s11 + $0x8] sm:$0xff] %v443_v9  ;;  %p1052_p13 = scmp.ne.s32.totalorder %s1552_s30, %s1051_s1  ;;  %p1793_p0 = scmp.ne.s32.totalorder %s1780_s12, 0 }
  0xa6   : > { %448 = vst [vmem:[%s1540_s11 + $0x10] sm:$0xff] %v446_v10  ;;  %449 = vst [vmem:[%s1540_s11 + $0x18] sm:$0xff] %v447_v11  ;;  %v450_v12 = vld [vmem:[%s1522_s9] sm:$0xff]  ;;  %v451_v13 = vld [vmem:[%s1522_s9 + $0x8] sm:$0xff]  ;;  %s1225_s16 = smov [#allocation11]  }
  0xa7   : > { %v454_v14 = vld [vmem:[%s1526_s22] sm:$0xff]  ;;  %p1053_p8 = pnand %p1052_p13, %p1793_p0  ;;  %s1055_s17 = sshll.u32 %s1225_s16, 4  ;;  %s1056_s17 = int_to_ptr.vmem [resolvable:$false] %s1055_s17 }
  0xa8   : > { %s1057_s20 = scalar_lea.vmem %s1056_s17, 2048  ;;  %p1058_p11 = scmp.lt.s32.totalorder %s1552_s30, %s1056_s17 }
  0xa9   : > { %p1054_p10 = pneg %p1053_p8  ;;  %p1059_p4 = scmp.lt.s32.totalorder %s1057_s20, %s1051_s1 }
  0xab   : > { %p1060_p3 = por %p1059_p4, %p1058_p11 }
  0xad   : > { %p1061_p5 = pnand %p1060_p3, %p1054_p10 }
  0xaf   : > { %1064 = shalt.err (!%p1061_p5)
}
  0xb0   : > { %s1065_s28 = scalar_lea.hbm %s1550_s0, 1024  ;;  %s1069_s16 = scalar_lea.hbm %s1757_s5, 2048 }
  0xb1   : > { %p1066_p1 = scmp.ne.s32.totalorder %s1550_s0, %s1065_s28  ;;  %p1070_p12 = scmp.lt.u32.totalorder %s1550_s0, %s1757_s5 }
  0xb2   : > { %p1071_p2 = scmp.lt.u32.totalorder %s1069_s16, %s1065_s28  ;;  %p1073_p13 = scmp.lt.u32.totalorder %s1065_s28, %s1550_s0 }
  0xb3   : > { %p1067_p7 = pnand %p1066_p1, %p1793_p0 }
  0xb4   : > { %p1072_p6 = por %p1071_p2, %p1070_p12 }
  0xb5   : > { %p1068_p9 = pneg %p1067_p7 }
  0xb6   : > { %p1074_p8 = por %p1073_p13, %p1072_p6 }
  0xb8   : > { %p1075_p10 = pnand %p1074_p8, %p1068_p9 }
  0xba   : > { %1078 = shalt.err (!%p1075_p10)
}
  0xbb   : > { %862 = dma.vmem_to_hbm [thread:$0]  (%p1793_p0), %s1552_s30, 1024, %s1550_s0, %s1581_s26   ;;  %452 = vst [vmem:[%s1540_s11 + $0x20] sm:$0xff] %v450_v12  ;;  %453 = vst [vmem:[%s1540_s11 + $0x28] sm:$0xff] %v451_v13  ;;  %v455_v15 = vld [vmem:[%s1526_s22 + $0x8] sm:$0xff]  ;;  %v474_v16 = vld [vmem:[%s1505_s8 + $0x20] sm:$0xff] }
  0xbc   : > { %456 = vst [vmem:[%s1540_s11 + $0x30] sm:$0xff] %v454_v14  ;;  %s1794_s2 = sshll.u32 %s1558_s19, 4  ;;  %v475_v17 = vld [vmem:[%s1505_s8 + $0x28] sm:$0xff]  ;;  %s1616_s23 = scalar_lea.vmem [#allocation14], %s1501_s18  ;;  %457 = vst [vmem:[%s1540_s11 + $0x38] sm:$0xff] %v455_v15  ;;  %v478_v18 = vld [vmem:[%s1515_s10 + $0x20] sm:$0xff]  ;;  %s1612_s2 = int_to_ptr.vmem [resolvable:$true] %s1794_s2 }
  0xbd   : > { %476 = vst [vmem:[%s1558_s19] sm:$0xff] %v474_v16  ;;  %477 = vst [vmem:[%s1558_s19 + $0x8] sm:$0xff] %v475_v17  ;;  %v479_v19 = vld [vmem:[%s1515_s10 + $0x28] sm:$0xff]  ;;  %v482_v20 = vld [vmem:[%s1522_s9 + $0x20] sm:$0xff]  ;;  %s1629_s20 = scalar_lea.hbm %s1758_s6, %s1533_s27  ;;  %s507_s18 = scalar_lea.sflag [#allocation4], %s1498_s29 }
  0xbe   : > { %480 = vst [vmem:[%s1558_s19 + $0x10] sm:$0xff] %v478_v18  ;;  %481 = vst [vmem:[%s1558_s19 + $0x18] sm:$0xff] %v479_v19  ;;  %v483_v21 = vld [vmem:[%s1522_s9 + $0x28] sm:$0xff]  ;;  %v486_v22 = vld [vmem:[%s1526_s22 + $0x20] sm:$0xff]  ;;  %s1079_s11 = scalar_lea.vmem %s1571_s15, 1024  ;;  %s1226_s28 = smov [#allocation10]  }
  0xbf   : > { %484 = vst [vmem:[%s1558_s19 + $0x20] sm:$0xff] %v482_v20  ;;  %v487_v23 = vld [vmem:[%s1526_s22 + $0x28] sm:$0xff]  ;;  %p1080_p11 = scmp.ne.s32.totalorder %s1571_s15, %s1079_s11  ;;  %s1083_s14 = sshll.u32 %s1226_s28, 4  ;;  %s1084_s14 = int_to_ptr.vmem [resolvable:$false] %s1083_s14 }
  0xc0   : > { %s1085_s16 = scalar_lea.vmem %s1084_s14, 2048  ;;  %p1086_p5 = scmp.lt.s32.totalorder %s1571_s15, %s1084_s14 }
  0xc1   : > { %p1081_p4 = pnand %p1080_p11, %p1793_p0  ;;  %p1087_p1 = scmp.lt.s32.totalorder %s1085_s16, %s1079_s11 }
  0xc3   : > { %p1082_p3 = pneg %p1081_p4  ;;  %p1088_p7 = por %p1087_p1, %p1086_p5 }
  0xc5   : > { %p1089_p9 = pnand %p1088_p7, %p1082_p3 }
  0xc7   : > { %1092 = shalt.err (!%p1089_p9)
}
  0xc8   : > { %s1093_s17 = scalar_lea.hbm %s1569_s21, 1024  ;;  %s1097_s28 = scalar_lea.hbm %s1756_s4, 2048 }
  0xc9   : > { %p1094_p12 = scmp.ne.s32.totalorder %s1569_s21, %s1093_s17  ;;  %p1098_p13 = scmp.lt.u32.totalorder %s1569_s21, %s1756_s4 }
  0xca   : > { %p1099_p8 = scmp.lt.u32.totalorder %s1097_s28, %s1093_s17  ;;  %p1101_p11 = scmp.lt.u32.totalorder %s1093_s17, %s1569_s21 }
  0xcb   : > { %p1095_p2 = pnand %p1094_p12, %p1793_p0 }
  0xcc   : > { %p1100_p10 = por %p1099_p8, %p1098_p13 }
  0xcd   : > { %p1096_p6 = pneg %p1095_p2 }
  0xce   : > { %p1102_p4 = por %p1101_p11, %p1100_p10 }
  0xd0   : > { %p1103_p3 = pnand %p1102_p4, %p1096_p6 }
  0xd2   : > { %1106 = shalt.err (!%p1103_p3)
}
  0xd3   : > { %861 = dma.vmem_to_hbm [thread:$0]  (%p1793_p0), %s1571_s15, 1024, %s1569_s21, %s507_s18   ;;  %485 = vst [vmem:[%s1558_s19 + $0x28] sm:$0xff] %v483_v21  ;;  %488 = vst [vmem:[%s1558_s19 + $0x30] sm:$0xff] %v486_v22  ;;  %v490_v24 = vld [vmem:[%s1505_s8 + $0x30] sm:$0xff]  ;;  %v491_v25 = vld [vmem:[%s1505_s8 + $0x38] sm:$0xff] }
  0xd4   : > { %489 = vst [vmem:[%s1558_s19 + $0x38] sm:$0xff] %v487_v23  ;;  %v494_v26 = vld [vmem:[%s1515_s10 + $0x30] sm:$0xff]  ;;  %s1669_s16 = scalar_lea.hbm %s1759_s7, %s1533_s27  ;;  %s1795_s17 = sshll.u32 %s1616_s23, 4  ;;  %492 = vst [vmem:[%s1616_s23] sm:$0xff] %v490_v24  ;;  %v495_v27 = vld [vmem:[%s1515_s10 + $0x38] sm:$0xff]  ;;  %s1673_s17 = int_to_ptr.vmem [resolvable:$true] %s1795_s17 }
  0xd5   : > { %493 = vst [vmem:[%s1616_s23 + $0x8] sm:$0xff] %v491_v25  ;;  %496 = vst [vmem:[%s1616_s23 + $0x10] sm:$0xff] %v494_v26  ;;  %v498_v28 = vld [vmem:[%s1522_s9 + $0x30] sm:$0xff]  ;;  %v499_v29 = vld [vmem:[%s1522_s9 + $0x38] sm:$0xff]  ;;  %s1107_s15 = scalar_lea.vmem %s1612_s2, 1024  ;;  %s1227_s8 = smov [#allocation13]  }
  0xd6   : > { %p1108_p5 = scmp.ne.s32.totalorder %s1612_s2, %s1107_s15  ;;  %s1111_s19 = sshll.u32 %s1227_s8, 4  ;;  %s1112_s19 = int_to_ptr.vmem [resolvable:$false] %s1111_s19 }
  0xd7   : > { %s1113_s27 = scalar_lea.vmem %s1112_s19, 2048  ;;  %p1114_p9 = scmp.lt.s32.totalorder %s1612_s2, %s1112_s19 }
  0xd8   : > { %p1109_p1 = pnand %p1108_p5, %p1793_p0  ;;  %p1115_p12 = scmp.lt.s32.totalorder %s1113_s27, %s1107_s15 }
  0xda   : > { %p1110_p7 = pneg %p1109_p1  ;;  %p1116_p2 = por %p1115_p12, %p1114_p9 }
  0xdc   : > { %p1117_p6 = pnand %p1116_p2, %p1110_p7 }
  0xde   : > { %1120 = shalt.err (!%p1117_p6)
}
  0xdf   : > { %s1121_s10 = scalar_lea.hbm %s1629_s20, 1024  ;;  %s1125_s18 = scalar_lea.hbm %s1758_s6, 2048 }
  0xe0   : > { %p1122_p13 = scmp.ne.s32.totalorder %s1629_s20, %s1121_s10  ;;  %p1126_p11 = scmp.lt.u32.totalorder %s1629_s20, %s1758_s6 }
  0xe1   : > { %p1127_p4 = scmp.lt.u32.totalorder %s1125_s18, %s1121_s10  ;;  %p1129_p5 = scmp.lt.u32.totalorder %s1121_s10, %s1629_s20 }
  0xe2   : > { %p1123_p8 = pnand %p1122_p13, %p1793_p0 }
  0xe3   : > { %p1128_p3 = por %p1127_p4, %p1126_p11 }
  0xe4   : > { %p1124_p10 = pneg %p1123_p8 }
  0xe5   : > { %p1130_p1 = por %p1129_p5, %p1128_p3 }
  0xe7   : > { %p1131_p7 = pnand %p1130_p1, %p1124_p10 }
  0xe9   : > { %1134 = shalt.err (!%p1131_p7)
}
  0xea   : > { %863 = dma.vmem_to_hbm [thread:$0]  (%p1793_p0), %s1612_s2, 1024, %s1629_s20, %s1581_s26   ;;  %497 = vst [vmem:[%s1616_s23 + $0x18] sm:$0xff] %v495_v27  ;;  %500 = vst [vmem:[%s1616_s23 + $0x20] sm:$0xff] %v498_v28  ;;  %v502_v30 = vld [vmem:[%s1526_s22 + $0x30] sm:$0xff]  ;;  %v503_v31 = vld [vmem:[%s1526_s22 + $0x38] sm:$0xff] }
  0xeb   : > { %501 = vst [vmem:[%s1616_s23 + $0x28] sm:$0xff] %v499_v29  ;;  %504 = vst [vmem:[%s1616_s23 + $0x30] sm:$0xff] %v502_v30  ;;  %s522_s28 = scalar_lea.sflag [#allocation15], %s1498_s29  ;;  %s1135_s14 = scalar_lea.vmem %s1673_s17, 1024 }
  0xec   : > { %505 = vst [vmem:[%s1616_s23 + $0x38] sm:$0xff] %v503_v31  ;;  %p1136_p9 = scmp.ne.s32.totalorder %s1673_s17, %s1135_s14  ;;  %s1228_s30 = smov [#allocation14]  }
  0xed   : > { %s1139_s11 = sshll.u32 %s1228_s30, 4  ;;  %s1140_s11 = int_to_ptr.vmem [resolvable:$false] %s1139_s11 }
  0xee   : > { %p1137_p12 = pnand %p1136_p9, %p1793_p0  ;;  %s1141_s15 = scalar_lea.vmem %s1140_s11, 2048 }
  0xef   : > { %p1142_p6 = scmp.lt.s32.totalorder %s1673_s17, %s1140_s11  ;;  %p1143_p13 = scmp.lt.s32.totalorder %s1141_s15, %s1135_s14 }
  0xf0   : > { %p1138_p2 = pneg %p1137_p12 }
  0xf1   : > { %p1144_p8 = por %p1143_p13, %p1142_p6 }
  0xf3   : > { %p1145_p10 = pnand %p1144_p8, %p1138_p2 }
  0xf5   : > { %1148 = shalt.err (!%p1145_p10)
}
  0xf6   : > { %s1149_s29 = scalar_lea.hbm %s1669_s16, 1024  ;;  %s1153_s2 = scalar_lea.hbm %s1759_s7, 2048 }
  0xf7   : > { %p1150_p11 = scmp.ne.s32.totalorder %s1669_s16, %s1149_s29  ;;  %p1154_p5 = scmp.lt.u32.totalorder %s1669_s16, %s1759_s7 }
  0xf8   : > { %p1155_p1 = scmp.lt.u32.totalorder %s1153_s2, %s1149_s29  ;;  %p1157_p9 = scmp.lt.u32.totalorder %s1149_s29, %s1669_s16 }
  0xf9   : > { %p1151_p4 = pnand %p1150_p11, %p1793_p0 }
  0xfa   : > { %p1156_p7 = por %p1155_p1, %p1154_p5 }
  0xfb   : > { %p1152_p3 = pneg %p1151_p4 }
  0xfc   : > { %p1158_p12 = por %p1157_p9, %p1156_p7 }
  0xfe   : > { %p1159_p2 = pnand %p1158_p12, %p1152_p3 }
 0x100   : > { %1162 = shalt.err (!%p1159_p2)
}
 0x101   : > { %864 = dma.vmem_to_hbm [thread:$0]  (%p1793_p0), %s1673_s17, 1024, %s1669_s16, %s522_s28  }
 0x102 PF: > { %s1796_s8 = sld [smem:[#allocation23_spill]]  ;;  %s590_s19 = sand.u32 1, %s1205_s24  }
 0x103   : > { %p1797_p6 = scmp.ne.s32.totalorder %s1781_s13, 0  ;;  %s591_s27 = scalar_lea.sflag [#allocation4], %s590_s19 }
 0x108   : > { %p1798_p13 = scmp.ge.s32.totalorder %s1796_s8, 2 }
 0x10a   : > { %p883_p8 = pnand %p1798_p13, %p1797_p6 }
 0x10c   : > { %1192 = dma.done.wait (!%p883_p8), %s591_s27, 1024  }
 0x10d   : > { %1194 = vsyncadd (!%p883_p8), %s591_s27, 4294966272  ;;  %s1799_s10 = sadd.s32 4294967294, %s1796_s8  }
 0x10e   : > { %s599_s9 = sand.u32 1, %s1799_s10  }
 0x10f   : > { %s600_s21 = scalar_lea.sflag [#allocation12], %s599_s9 }
 0x110   : > { %1196 = dma.done.wait (!%p883_p8), %s600_s21, 2048  }
 0x111   : > { %1198 = vsyncadd (!%p883_p8), %s600_s21, 4294965248  ;;  %s618_s12 = scalar_lea.sflag [#allocation15], %s590_s19 }
 0x112   : > { %1200 = dma.done.wait (!%p883_p8), %s618_s12, 1024  }
 0x113   : > { %1202 = vsyncadd (!%p883_p8), %s618_s12, 4294966272  ;;  %s1800_s27 = sld [smem:[#allocation24_spill]]  ;;  %s1801_s16 = sld [smem:[#allocation22_spill]] }
 0x114   : > { %s1802_s26 = sld [smem:[#allocation25_spill]]  ;;  %s1803_s24 = smov %s1209_s25 }
 0x119   : > { %p33_p0 = scmp.ge.s32.totalorder %s1800_s27, 4   ;;  %s1804_s25 = smov %s1801_s16 }
 0x11b   :  { %35 = sbr.rel (!%p33_p0) target bundleno = 17 (0x11), region = 167 }
 0x122   :  { %623 = vsyncpa [#allocation3], 1 }
 0x123   :  { %625 = vsyncpa [#allocation3 + $0x1], 1 }
 0x124   :  { %626 = vsyncpa [#allocation6], 1 }
 0x125   :  { %628 = vsyncpa [#allocation6 + $0x1], 1 }
 0x126   :  { %629 = vsyncpa [#allocation9], 1 }
 0x127   :  { %631 = vsyncpa [#allocation9 + $0x1], 1 }
 0x128   :  { %632 = vsyncpa [#allocation4], 1 }
 0x129   :  { %634 = vsyncpa [#allocation4 + $0x1], 1 }
 0x12a   :  { %635 = vsyncpa [#allocation12], 1 }
 0x12b   :  { %637 = vsyncpa [#allocation12 + $0x1], 1 }
 0x12c   :  { %638 = vsyncpa [#allocation15], 1 }
 0x12d   :  { %640 = vsyncpa [#allocation15 + $0x1], 1 }

</bundles_post_ra>
